<compile_context>
chip_gen: v7x
topology: tpu7x:2x2x1
jax: 0.10.0
libtpu: 0.0.40
codegen_flags: <defaults>
</compile_context>

<pallas_src>
import functools

import jax
import jax.numpy as jnp
from jax import lax
from jax.experimental import pallas as pl
from jax.experimental.pallas import tpu as pltpu

EPS = 1e-5  # PyTorch LayerNorm default


def _patch_expand_kernel(x_ref, w_ref, g_ref, b_ref, o_ref):
    """One (batch, row-tile, output-row-parity) block.

    x_ref: (1, TH*W, C)        input tokens (TH whole image rows)
    w_ref: (2, C, 2*cout)      bf16 expand weight, BOTH parities, VMEM-resident
    g_ref: (1, 2*cout)         LayerNorm gamma, tiled over the 2 j-groups
    b_ref: (1, 2*cout)         LayerNorm beta,  tiled over the 2 j-groups
    o_ref: (1, TH, 1, W, 2*cout) output rows of parity i (final layout)
    """
    i = pl.program_id(2)                                  # output-row parity
    x = x_ref[0]                                          # (N, C)
    w = w_ref[i]                                          # (C, 2*cout) bf16

    # Expand matmul on the MXU in bf16, f32 accumulation.
    y = jnp.dot(x.astype(jnp.bfloat16), w,
                preferred_element_type=jnp.float32)       # (N, 2*cout) f32

    cc = y.shape[-1]
    cout = cc // 2
    inv_c = 1.0 / float(cout)

    # Grouped LayerNorm over the two contiguous cout-wide lane groups (= the
    # two output pixels j of this row parity).  Stats via masked lane
    # reductions; variance is two-pass E[(y-mean)^2] for accuracy.
    lane = lax.broadcasted_iota(jnp.int32, (1, cc), 1)
    in_g0 = lane < cout                                   # (1, cc) group mask

    s0 = jnp.sum(jnp.where(in_g0, y, 0.0), axis=-1, keepdims=True)
    s_all = jnp.sum(y, axis=-1, keepdims=True)
    mean = jnp.where(in_g0, s0, s_all - s0) * inv_c       # (N, cc)

    d = y - mean
    dd = d * d
    v0 = jnp.sum(jnp.where(in_g0, dd, 0.0), axis=-1, keepdims=True)
    v_all = jnp.sum(dd, axis=-1, keepdims=True)
    var = jnp.where(in_g0, v0, v_all - v0) * inv_c        # (N, cc)

    # Fused epilogue: no separate yn / y*y kept live past the stats.
    scale = lax.rsqrt(var + EPS) * g_ref[...]             # (N, cc)
    out = d * scale + b_ref[...]                          # (N, cc)

    th = o_ref.shape[1]
    wpix = o_ref.shape[3]
    # (TH*W, 2*cout) -> (TH, W, 2*cout): leading-dim split only (lane dim
    # unchanged), then a single full-block store.
    o_ref[0, :, 0, :, :] = out.reshape(th, wpix, cc).astype(o_ref.dtype)


def prepare_patch_expand_params(w_expand, gamma, beta):
    """One-time parameter preparation (run once at setup, not per forward).

    w_expand: (2C, C)    nn.Linear(dim, 2*dim, bias=False).weight
    gamma, beta: (C//2,) nn.LayerNorm(dim // 2) affine parameters
    """
    two_c, c_in = w_expand.shape
    assert two_c == 2 * c_in
    cout = c_in // 2

    # PyTorch Linear: y = x @ w_expand.T.  PixelShuffle(2) reads output
    # channel o = c*4 + i*2 + j.  Reorder output channels to
    # o' = i*(2*cout) + j*cout + c so that (a) the two output-row parities i
    # are contiguous halves (selected in-kernel by the grid's parity axis) and
    # (b) each LayerNorm group (= one output pixel) is a contiguous cout slab.
    w_perm = (w_expand.reshape(cout, 4, c_in)
                      .transpose(1, 0, 2)
                      .reshape(2 * c_in, c_in))
    wt = w_perm.T                                          # (C, 2C), cols = o'
    w3 = wt.reshape(c_in, 2, 2 * cout).transpose(1, 0, 2)  # (2, C, 2*cout)
    w3 = w3.astype(jnp.bfloat16)

    gamma2 = jnp.tile(gamma.astype(jnp.float32), 2).reshape(1, 2 * cout)
    beta2 = jnp.tile(beta.astype(jnp.float32), 2).reshape(1, 2 * cout)
    return w3, gamma2, beta2


def _pick_row_tile(H, W, C, B, budget_bytes=8 << 20):
    """Largest legal row tile TH (TH | H) whose token count fits a VMEM budget.

    ~40*C bytes per token: double-buffered x + out blocks (f32) plus ~6 live
    f32 temporaries of width 2*cout = C inside the kernel.
    """
    per_token = 40 * C
    target = max(64, min(4096, budget_bytes // per_token))

    cands = []
    for th in range(1, H + 1):
        if H % th:
            continue
        tl = th * W
        # (8,128) rule: a partial second-minor block dim must be a multiple
        # of 8 (a full-extent dim, th == H, is always legal).
        if tl % 8 and th != H:
            continue
        cands.append(th)

    fit = [th for th in cands if th * W <= target]
    th = max(fit) if fit else min(cands)

    # v7x has two TensorCores: prefer >=2 row tiles when batch alone doesn't
    # provide >=2 parallel grid points (the parity axis covers the remainder).
    if B * (H // th) < 2:
        smaller = [t for t in (fit or cands) if t < th]
        if smaller:
            th = max(smaller)
    return th


@functools.partial(jax.jit, static_argnames=("H", "W", "out_dtype"))
def patch_expand(x, H, W, w3, gamma2, beta2, out_dtype=jnp.float32):
    """x: (B, H*W, C) -> (out: (B, 4*H*W, C//2), 2H, 2W)."""
    B, L, C = x.shape
    assert L == H * W, "invalid input size"
    cout = C // 2

    TH = _pick_row_tile(H, W, C, B)
    n_row_tiles = H // TH
    tl = TH * W

    # Output is produced directly in its final memory layout, viewed 5-D as
    # (B, H, parity_i, W, j*cout + c); flattening it row-major is exactly the
    # pixel-shuffled token order (2h+i)*(2W) + (2w+j), channel c.
    z = pl.pallas_call(
        _patch_expand_kernel,
        out_shape=jax.ShapeDtypeStruct((B, H, 2, W, 2 * cout), out_dtype),
        grid_spec=pltpu.PrefetchScalarGridSpec(
            num_scalar_prefetch=0,
            grid=(B, n_row_tiles, 2),
            in_specs=[
                pl.BlockSpec((1, tl, C), lambda b, t, i: (b, t, 0)),
                # Resident weight: constant index -> fetched once, never
                # re-DMA'd (parity selected inside the kernel).
                pl.BlockSpec((2, C, 2 * cout), lambda b, t, i: (0, 0, 0)),
                pl.BlockSpec((1, 2 * cout), lambda b, t, i: (0, 0)),
                pl.BlockSpec((1, 2 * cout), lambda b, t, i: (0, 0)),
            ],
            out_specs=pl.BlockSpec((1, TH, 1, W, 2 * cout),
                                   lambda b, t, i: (b, t, i, 0, 0)),
        ),
        compiler_params=pltpu.CompilerParams(
            # All output blocks are written exactly once -> every axis may be
            # sharded across TensorCores (keeps v7x busy even when
            # B * n_row_tiles == 1).
            dimension_semantics=("parallel", "parallel", "parallel"),
            vmem_limit_bytes=32 * 1024 * 1024),
    )(x, w3, gamma2, beta2)

    # Pure row-major collapse to the module's (B, 4HW, C//2) output.
    out = z.reshape(B, 4 * H * W, cout)
    return out, 2 * H, 2 * W


def _reference(x, H, W, w_expand, gamma, beta):
    """Pure-JAX (f32) replica of the PyTorch forward for validation."""
    B, L, C = x.shape
    cout = C // 2
    y = x @ w_expand.T                                        # (B, L, 2C)
    y = y.reshape(B, H, W, 2 * C).transpose(0, 3, 1, 2)       # (B, 2C, H, W)
    # PixelShuffle(2): out[b, c, 2h+i, 2w+j] = in[b, c*4 + i*2 + j, h, w]
    y = (y.reshape(B, cout, 2, 2, H, W)
           .transpose(0, 1, 4, 2, 5, 3)
           .reshape(B, cout, 2 * H, 2 * W))
    y = y.transpose(0, 2, 3, 1).reshape(B, 4 * H * W, cout)
    mean = y.mean(-1, keepdims=True)
    var = ((y - mean) ** 2).mean(-1, keepdims=True)
    return (y - mean) / jnp.sqrt(var + EPS) * gamma + beta


if __name__ == "__main__":
    key = jax.random.PRNGKey(0)
    k_x, k_w, k_g, k_b = jax.random.split(key, 4)

    B, H, W, dim = 2, 8, 8, 32                    # x: (B, H*W, dim)
    x = jax.random.normal(k_x, (B, H * W, dim), dtype=jnp.float32)

    # Deterministic synthetic parameters (shapes from __init__ with dim_scale=2).
    w_expand = jax.random.normal(k_w, (2 * dim, dim), dtype=jnp.float32) * 0.05
    gamma = 1.0 + 0.1 * jax.random.normal(k_g, (dim // 2,), dtype=jnp.float32)
    beta = 0.1 * jax.random.normal(k_b, (dim // 2,), dtype=jnp.float32)

    params = prepare_patch_expand_params(w_expand, gamma, beta)
    out, H2, W2 = patch_expand(x, H, W, *params)
    out = jax.block_until_ready(out)

    ref = _reference(x, H, W, w_expand, gamma, beta)
    assert out.shape == (B, 4 * H * W, dim // 2)
    assert (H2, W2) == (2 * H, 2 * W)
    # Tolerance widened vs the pure-f32 reference because the expand matmul
    # runs with bf16 inputs on the MXU (LayerNorm amplifies the rounding);
    # variance is two-pass so the LN itself is not the error source.
    err = float(jnp.max(jnp.abs(out - ref)))
    assert jnp.allclose(out, ref, atol=5e-2, rtol=2e-2), f"mismatch vs reference: {err}"

    print("KERNEL_OK")
</pallas_src>

<mosaic_0001>
module attributes {stable_mosaic.version = 11 : i64} {
  func.func @_patch_expand_kernel(%arg0: i32, %arg1: i32, %arg2: i32, %arg3: memref<1x64x32xf32, #tpu.memory_space<vmem>>, %arg4: memref<2x32x32xbf16, #tpu.memory_space<vmem>>, %arg5: memref<1x32xf32, #tpu.memory_space<vmem>>, %arg6: memref<1x32xf32, #tpu.memory_space<vmem>>, %arg7: memref<1x8x1x8x32xf32, #tpu.memory_space<vmem>>) attributes {dimension_semantics = [#tpu.dimension_semantics<parallel>, #tpu.dimension_semantics<parallel>, #tpu.dimension_semantics<parallel>], iteration_bounds = array<i64: 2, 1, 2>, scalar_prefetch = 0 : i64, scratch_operands = 0 : i64, tpu.core_type = #tpu.core_type<tc>, window_params = [{transform_indices = @transform_0, window_bounds = array<i64: 1, 64, 32>}, {pipeline_mode = #tpu.pipeline_mode<synchronous>, transform_indices = @transform_1, window_bounds = array<i64: 2, 32, 32>}, {pipeline_mode = #tpu.pipeline_mode<synchronous>, transform_indices = @transform_2, window_bounds = array<i64: 1, 32>}, {pipeline_mode = #tpu.pipeline_mode<synchronous>, transform_indices = @transform_3, window_bounds = array<i64: 1, 32>}, {transform_indices = @transform_4, window_bounds = array<i64: 1, 8, 1, 8, 32>}]} {
    %c0 = arith.constant 0 : index
    %c0_0 = arith.constant 0 : index
    %c0_1 = arith.constant 0 : index
    %0 = vector.load %arg3[%c0, %c0_0, %c0_1] : memref<1x64x32xf32, #tpu.memory_space<vmem>>, vector<1x64x32xf32>
    %1 = vector.shape_cast %0 : vector<1x64x32xf32> to vector<64x32xf32>
    %2 = arith.index_cast %arg2 : i32 to index
    %c0_2 = arith.constant 0 : index
    %c0_3 = arith.constant 0 : index
    %3 = vector.load %arg4[%2, %c0_2, %c0_3] : memref<2x32x32xbf16, #tpu.memory_space<vmem>>, vector<1x32x32xbf16>
    %4 = vector.shape_cast %3 : vector<1x32x32xbf16> to vector<32x32xbf16>
    %5 = arith.truncf %1 : vector<64x32xf32> to vector<64x32xbf16>
    %cst = arith.constant dense<0.000000e+00> : vector<64x32xf32>
    %6 = tpu.matmul %5, %4, %cst {dimension_numbers = #tpu.dot_dimension_numbers<[1], [0], [0], [1], [0, 0, 1, 1], [], []>} : vector<64x32xbf16>, vector<32x32xbf16>, vector<64x32xf32> -> vector<64x32xf32>
    %7 = tpu.iota {dimensions = array<i32: 1>} : vector<1x32xi32>
    %c16_i32 = arith.constant 16 : i32
    %8 = vector.broadcast %c16_i32 : i32 to vector<1x32xi32>
    %9 = arith.cmpi slt, %7, %8 : vector<1x32xi32>
    %cst_4 = arith.constant 0.000000e+00 : f32
    %10 = vector.shape_cast %9 : vector<1x32xi1> to vector<1x32xi1>
    %11 = vector.broadcast %10 : vector<1x32xi1> to vector<64x32xi1>
    %12 = vector.broadcast %cst_4 : f32 to vector<64x32xf32>
    %13 = arith.select %11, %6, %12 : vector<64x32xi1>, vector<64x32xf32>
    %cst_5 = arith.constant dense<0.000000e+00> : vector<64xf32>
    %14 = vector.multi_reduction <add>, %13, %cst_5 [1] : vector<64x32xf32> to vector<64xf32>
    %15 = vector.shape_cast %14 : vector<64xf32> to vector<64x1xf32>
    %cst_6 = arith.constant dense<0.000000e+00> : vector<64xf32>
    %16 = vector.multi_reduction <add>, %6, %cst_6 [1] : vector<64x32xf32> to vector<64xf32>
    %17 = vector.shape_cast %16 : vector<64xf32> to vector<64x1xf32>
    %18 = arith.subf %17, %15 : vector<64x1xf32>
    %19 = vector.shape_cast %9 : vector<1x32xi1> to vector<1x32xi1>
    %20 = vector.broadcast %19 : vector<1x32xi1> to vector<64x32xi1>
    %21 = vector.shape_cast %15 : vector<64x1xf32> to vector<64x1xf32>
    %22 = vector.broadcast %21 : vector<64x1xf32> to vector<64x32xf32>
    %23 = vector.shape_cast %18 : vector<64x1xf32> to vector<64x1xf32>
    %24 = vector.broadcast %23 : vector<64x1xf32> to vector<64x32xf32>
    %25 = arith.select %20, %22, %24 : vector<64x32xi1>, vector<64x32xf32>
    %cst_7 = arith.constant 6.250000e-02 : f32
    %26 = vector.broadcast %cst_7 : f32 to vector<64x32xf32>
    %27 = arith.mulf %25, %26 : vector<64x32xf32>
    %28 = arith.subf %6, %27 : vector<64x32xf32>
    %29 = arith.mulf %28, %28 : vector<64x32xf32>
    %cst_8 = arith.constant 0.000000e+00 : f32
    %30 = vector.shape_cast %9 : vector<1x32xi1> to vector<1x32xi1>
    %31 = vector.broadcast %30 : vector<1x32xi1> to vector<64x32xi1>
    %32 = vector.broadcast %cst_8 : f32 to vector<64x32xf32>
    %33 = arith.select %31, %29, %32 : vector<64x32xi1>, vector<64x32xf32>
    %cst_9 = arith.constant dense<0.000000e+00> : vector<64xf32>
    %34 = vector.multi_reduction <add>, %33, %cst_9 [1] : vector<64x32xf32> to vector<64xf32>
    %35 = vector.shape_cast %34 : vector<64xf32> to vector<64x1xf32>
    %cst_10 = arith.constant dense<0.000000e+00> : vector<64xf32>
    %36 = vector.multi_reduction <add>, %29, %cst_10 [1] : vector<64x32xf32> to vector<64xf32>
    %37 = vector.shape_cast %36 : vector<64xf32> to vector<64x1xf32>
    %38 = arith.subf %37, %35 : vector<64x1xf32>
    %39 = vector.shape_cast %9 : vector<1x32xi1> to vector<1x32xi1>
    %40 = vector.broadcast %39 : vector<1x32xi1> to vector<64x32xi1>
    %41 = vector.shape_cast %35 : vector<64x1xf32> to vector<64x1xf32>
    %42 = vector.broadcast %41 : vector<64x1xf32> to vector<64x32xf32>
    %43 = vector.shape_cast %38 : vector<64x1xf32> to vector<64x1xf32>
    %44 = vector.broadcast %43 : vector<64x1xf32> to vector<64x32xf32>
    %45 = arith.select %40, %42, %44 : vector<64x32xi1>, vector<64x32xf32>
    %cst_11 = arith.constant 6.250000e-02 : f32
    %46 = vector.broadcast %cst_11 : f32 to vector<64x32xf32>
    %47 = arith.mulf %45, %46 : vector<64x32xf32>
    %cst_12 = arith.constant 9.99999974E-6 : f32
    %48 = vector.broadcast %cst_12 : f32 to vector<64x32xf32>
    %49 = arith.addf %47, %48 : vector<64x32xf32>
    %50 = math.rsqrt %49 : vector<64x32xf32>
    %c0_13 = arith.constant 0 : index
    %c0_14 = arith.constant 0 : index
    %51 = vector.load %arg5[%c0_13, %c0_14] : memref<1x32xf32, #tpu.memory_space<vmem>>, vector<1x32xf32>
    %52 = vector.broadcast %51 : vector<1x32xf32> to vector<64x32xf32>
    %53 = arith.mulf %50, %52 : vector<64x32xf32>
    %54 = arith.mulf %28, %53 : vector<64x32xf32>
    %c0_15 = arith.constant 0 : index
    %c0_16 = arith.constant 0 : index
    %55 = vector.load %arg6[%c0_15, %c0_16] : memref<1x32xf32, #tpu.memory_space<vmem>>, vector<1x32xf32>
    %56 = vector.broadcast %55 : vector<1x32xf32> to vector<64x32xf32>
    %57 = arith.addf %54, %56 : vector<64x32xf32>
    %58 = vector.shape_cast %57 : vector<64x32xf32> to vector<8x8x32xf32>
    %c0_17 = arith.constant 0 : index
    %c0_18 = arith.constant 0 : index
    %c0_19 = arith.constant 0 : index
    %c0_20 = arith.constant 0 : index
    %c0_21 = arith.constant 0 : index
    %59 = vector.load %arg7[%c0_17, %c0_18, %c0_19, %c0_20, %c0_21] : memref<1x8x1x8x32xf32, #tpu.memory_space<vmem>>, vector<1x8x1x8x32xf32>
    %60 = vector.shape_cast %59 : vector<1x8x1x8x32xf32> to vector<8x8x32xf32>
    %61 = vector.shape_cast %58 : vector<8x8x32xf32> to vector<1x8x1x8x32xf32>
    tpu.vector_store %arg7[%c0_17, %c0_18, %c0_19, %c0_20, %c0_21], %61 {strides = array<i32>} : memref<1x8x1x8x32xf32, #tpu.memory_space<vmem>>, vector<1x8x1x8x32xf32>,
    return
  }
  func.func @transform_0(%arg0: i32, %arg1: i32, %arg2: i32) -> (i32, i32, i32) {
    %c0_i32 = arith.constant 0 : i32
    %c0_i32_0 = arith.constant 0 : i32
    return %arg0, %arg1, %c0_i32 : i32, i32, i32
  }
  func.func @transform_1(%arg0: i32, %arg1: i32, %arg2: i32) -> (i32, i32, i32) {
    %c0_i32 = arith.constant 0 : i32
    %c0_i32_0 = arith.constant 0 : i32
    %c0_i32_1 = arith.constant 0 : i32
    %c0_i32_2 = arith.constant 0 : i32
    return %c0_i32, %c0_i32_0, %c0_i32_1 : i32, i32, i32
  }
  func.func @transform_2(%arg0: i32, %arg1: i32, %arg2: i32) -> (i32, i32) {
    %c0_i32 = arith.constant 0 : i32
    %c0_i32_0 = arith.constant 0 : i32
    %c0_i32_1 = arith.constant 0 : i32
    return %c0_i32, %c0_i32_0 : i32, i32
  }
  func.func @transform_3(%arg0: i32, %arg1: i32, %arg2: i32) -> (i32, i32) {
    %c0_i32 = arith.constant 0 : i32
    %c0_i32_0 = arith.constant 0 : i32
    %c0_i32_1 = arith.constant 0 : i32
    return %c0_i32, %c0_i32_0 : i32, i32
  }
  func.func @transform_4(%arg0: i32, %arg1: i32, %arg2: i32) -> (i32, i32, i32, i32, i32) {
    %c0_i32 = arith.constant 0 : i32
    %c0_i32_0 = arith.constant 0 : i32
    %c0_i32_1 = arith.constant 0 : i32
    return %arg0, %arg1, %arg2, %c0_i32, %c0_i32_0 : i32, i32, i32, i32, i32
  }
}

</mosaic_0001>

<bundles_post_ra>
// kernel: patch_expand.1
= control target key start
LH: loop header
LB: loop body
LE: loop exit
PB: predicated region body
PF: predicated region fallthrough
CT: control target
= control target key end

     0   :  { %s938_s15 = smov 0   ;;  %s940_s16 = smov 0   ;;  %s1260_s0 = inlined_call_operand.vmem [shape: f32[2,64,32], index: 0, kind: input, shape index: {}]   ;;  %s1261_s1 = inlined_call_operand.vmem [shape: bf16[2,32,32], index: 1, kind: input, shape index: {}]   ;;  %s1262_s2 = inlined_call_operand.vmem [shape: f32[1,32], index: 2, kind: input, shape index: {}]   ;;  %s1263_s3 = inlined_call_operand.vmem [shape: f32[1,32], index: 3, kind: input, shape index: {}]   ;;  %s1264_s4 = inlined_call_operand.vmem [shape: f32[2,8,2,8,32], index: 4, kind: output, shape index: {}]  }
   0x1   :  { %s942_s17 = smov 0   ;;  %s944_s18 = smov 0  }
   0x2   :  { %s946_s19 = smov 0   ;;  %s948_s20 = smov 0  }
   0x3   :  { %s950_s21 = smov 0  }
   0x4 LB: > { %s26_s22 = sadd.s32 1, %s903_s19  ;;  %s33_s23 = sadd.s32 1, %s907_s20  ;;  %s911_s21 = sphi %s950_s21, %s14_s21   ;;  %s907_s20 = sphi %s948_s20, %s1271_s20   ;;  %s903_s19 = sphi %s946_s19, %s1270_s19   ;;  %s899_s18 = sphi %s944_s18, %s1269_s18   ;;  %s895_s17 = sphi %s942_s17, %s1268_s17   ;;  %s891_s16 = sphi %s940_s16, %s1267_s16   ;;  %s887_s15 = sphi %s938_s15, %s1266_s15  }
   0x5   : > { %p27_p0 = scmp.ge.s32.totalorder %s26_s22, 2  ;;  %s736_s24 = sadd.s32 4294967295, %s911_s21  }
   0x6   : > { %p145_p1 = scmp.ne.s32.totalorder %s891_s16, %s887_s15  ;;  %p146_p2 = scmp.eq.s32.totalorder %s736_s24, 3 }
   0x7   : > { %s1273_s22 = smov (%p27_p0, %s26_s22), 0  ;;  %s1275_s23 = smov (!%p27_p0, %s33_s23), %s907_s20 }
   0x8   : > { %s131_s25 = ssub.s32 %s903_s19, %s1273_s22  ;;  %p35_p3 = scmp.ge.s32.totalorder %s1275_s23, 2 }
   0x9   : > { %p740_p4 = scmp.ge.s32.totalorder %s911_s21, 1  ;;  %p984_p5 = por %p146_p2, %p145_p1 }
   0xa   : > { %p192_p6 = scmp.lt.s32.totalorder %s911_s21, 5  ;;  %s1277_s23 = smov (%p35_p3, %s1275_s23), 0 }
   0xb   : > { %s128_s27 = ssub.s32 %s907_s20, %s1277_s23  ;;  %s135_s29 = sadd.s32 1, %s891_s16 }
   0xc   : > { %p193_p7 = pnand %p740_p4, %p192_p6  ;;  %s132_s28 = sor.u32 %s131_s25, %s128_s27 }
   0xd   : > { %p133_p8 = scmp.eq.s32.totalorder %s132_s28, 0  ;;  %s760_s5 = sshll.u32 (!%p193_p7), %s895_s17, 4  ;;  %vm264_vm0 = vcmask (!%p193_p7), 261120   ;;  %v342_v14 = vlaneseq (!%p193_p7) }
   0xe   : > { %196 = sbr.rel (%p193_p7) target bundleno = 619 (0x26b), region = 36  ;;  %p222_p9 = scmp.lt.s32.totalorder (!%p193_p7), %s899_s18, 1 }
   0xf   : > { %s995_s30 = scalar_select %p133_p8, %s891_s16, %s135_s29  }
  0x10   : > { %s243_s8 = scalar_lea.vmem (!%p193_p7), %s1261_s1, %s760_s5  ;;  %v1010_v15 = vand.u32 (!%p193_p7), 127, %v342_v14  ;;  %s218_s25 = sand.u32 (!%p193_p7), 1, %s887_s15  }
  0x11   : > { %v839_v0 = vld [vmem:[%s243_s8] sm:$0xff] (!%p193_p7)   ;;  %v840_v1 = vld [vmem:[%s243_s8 + $0x8] sm:$0xff] (!%p193_p7)   ;;  %s741_s27 = sshll.u32 (!%p193_p7), %s218_s25, 6 }
  0x12   : > { %767 = vmatprep.subr.bf16.mxu0 (!%p193_p7), %v839_v0  ;;  %779 = vmatprep.subr.bf16.mxu1 (!%p193_p7), %v839_v0  ;;  %vm344_vm1 = vcmp.lt.s32.totalorder (!%p193_p7), %v1010_v15, 16  ;;  %s1173_s5 = scalar_lea.vmem (!%p193_p7), [#allocation2], %s741_s27 }
  0x13   : > { %768 = vmatpush3.bf16.msra.mxu0 (!%p193_p7), %v839_v0  ;;  %781 = vmatpush3.bf16.msra.mxu1 (!%p193_p7), %v839_v0 }
  0x14   : > { %769 = vmatprep.subr.bf16.mxu0 (!%p193_p7), %v840_v1  ;;  %780 = vmatprep.subr.bf16.mxu1 (!%p193_p7), %v840_v1 }
  0x15   : > { %s223_s9 = scalar_select %p222_p9, %s899_s18, 1 }
  0x16   : > { %s755_s15 = sshll.u32 (%p984_p5), %s899_s18, 4 }
  0x17   : > { %s759_s10 = sshll.u32 %s223_s9, 6  ;;  %770 = vmatpush3.bf16.msra.mxu0 %v840_v1  ;;  %782 = vmatpush3.bf16.msra.mxu1 %v840_v1  ;;  %s596_s6 = sadd.s32 (%p984_p5), %s895_s17, %s755_s15 }
  0x18   : > { %s229_s13 = scalar_lea.vmem %s1260_s0, %s759_s10  ;;  %s756_s26 = sshll.u32 (%p984_p5), %s596_s6, 3 }
  0x19   : > { %v233_v2 = vld [vmem:[%s229_s13] sm:$0xff]  ;;  %v234_v3 = vld [vmem:[%s229_s13 + $0x8] sm:$0xff]  ;;  %v235_v4 = vld [vmem:[%s229_s13 + $0x10] sm:$0xff]  ;;  %s598_s9 = scalar_lea.vmem (%p984_p5), %s1264_s4, %s756_s26 }
  0x1a   : > { %v248_v5 = vpack.c.bf16 %v234_v3, %v233_v2  ;;  %v236_v6 = vld [vmem:[%s229_s13 + $0x18] sm:$0xff]  ;;  %v237_v7 = vld [vmem:[%s229_s13 + $0x20] sm:$0xff]  ;;  %v238_v8 = vld [vmem:[%s229_s13 + $0x28] sm:$0xff] }
  0x1b   : > { %v249_v9 = vpack.c.bf16 %v236_v6, %v235_v4  ;;  %v250_v10 = vpack.c.bf16 %v238_v8, %v237_v7  ;;  %v239_v11 = vld [vmem:[%s229_s13 + $0x30] sm:$0xff]  ;;  %v240_v12 = vld [vmem:[%s229_s13 + $0x38] sm:$0xff] }
  0x1c   : > { %v251_v13 = vpack.c.bf16 %v240_v12, %v239_v11  ;;  %771 = vmatprep.mubr.msk.bf16.mxu0 %vm264_vm0, %v248_v5 }
  0x1d   : > { %775 = vmatprep.mubr.msk.bf16.mxu1 %vm264_vm0, %v250_v10  ;;  %772 = vmatmul.mubr.msk.bf16.vlgmr.msra.gmra.mrb[0].mxu0 %vm264_vm0, %v249_v9 }
  0x1e   : > { %776 = vmatmul.mubr.msk.bf16.vlgmr.msra.gmra.mrb[0].mxu1 %vm264_vm0, %v251_v13 }
  0xf0   : > { %v773_v16 = vpop.f32.mrb[0].mxu0 }
  0xf1   : > { %v1013_v17 = vpop.f32.mrb[0].mxu1  ;;  %v1015_v18 = vpop.f32.mrb[1].mxu0  ;;  %v385_v20 = vsel %vm264_vm0, %v773_v16, 0.0  ;;  %v349_v21 = vsel %vm344_vm1, %v773_v16, 0.0 }
  0xf2   : > { %v1017_v19 = vpop.f32.mrb[1].mxu1  ;;  %v353_v22 = vsel %vm344_vm1, %v1013_v17, 0.0  ;;  %386 = vadd.xlane.f32.xlu0 %v385_v20  ;;  %v774_v23 = vpop.f32.mrb[2].mxu0  ;;  %v361_v25 = vsel %vm264_vm0, %v349_v21, 0.0  ;;  %v379_v31 = vsel %vm264_vm0, %v1015_v18, 0.0  ;;  %v347_v36 = vsel %vm344_vm1, %v1015_v18, 0.0 }
  0xf3   : > { %v1025_v24 = vpop.f32.mrb[2].mxu1  ;;  %362 = vadd.xlane.f32.xlu1 %v361_v25  ;;  %v1028_v26 = vpop.f32.mrb[3].mxu0  ;;  %v373_v28 = vsel %vm264_vm0, %v353_v22, 0.0  ;;  %v388_v29 = vsel %vm264_vm0, %v774_v23, 0.0  ;;  %v350_v30 = vsel %vm344_vm1, %v774_v23, 0.0  ;;  %v391_v34 = vsel %vm264_vm0, %v1017_v19, 0.0 }
  0xf4   : > { %v1030_v27 = vpop.f32.mrb[3].mxu1  ;;  %v364_v32 = vsel %vm264_vm0, %v350_v30, 0.0  ;;  %v354_v33 = vsel %vm344_vm1, %v1025_v24, 0.0  ;;  %v355_v37 = vsel %vm264_vm0, %v347_v36, 0.0  ;;  %v382_v38 = vsel %vm264_vm0, %v1028_v26, 0.0 }
  0xf5   : > { %v376_v35 = vsel %vm264_vm0, %v354_v33, 0.0  ;;  %v351_v39 = vsel %vm344_vm1, %v1017_v19, 0.0  ;;  %v394_v41 = vsel %vm264_vm0, %v1030_v27, 0.0  ;;  %v348_v42 = vsel %vm344_vm1, %v1028_v26, 0.0 }
  0xf6   : > { %374 = vadd.xlane.f32.xlu0 %v373_v28  ;;  %v367_v40 = vsel %vm264_vm0, %v351_v39, 0.0  ;;  %v352_v43 = vsel %vm344_vm1, %v1030_v27, 0.0  ;;  %v358_v44 = vsel %vm264_vm0, %v348_v42, 0.0  ;;  %v397_v46 = vsel %vm264_vm0, %v1013_v17, 0.0 }
  0xf7   : > { %389 = vadd.xlane.f32.xlu1 %v388_v29  ;;  %v370_v45 = vsel %vm264_vm0, %v352_v43, 0.0  ;;  %v400_v47 = vsel %vm264_vm0, %v1025_v24, 0.0 }
  0xfa   : > { %380 = vadd.xlane.f32.xlu0 %v379_v31 }
  0xfb   : > { %365 = vadd.xlane.f32.xlu1 %v364_v32 }
  0xfe   : > { %392 = vadd.xlane.f32.xlu0 %v391_v34 }
  0xff   : > { %377 = vadd.xlane.f32.xlu1 %v376_v35 }
 0x102   : > { %356 = vadd.xlane.f32.xlu0 %v355_v37 }
 0x103   : > { %383 = vadd.xlane.f32.xlu1 %v382_v38 }
 0x106   : > { %368 = vadd.xlane.f32.xlu0 %v367_v40 }
 0x107   : > { %395 = vadd.xlane.f32.xlu1 %v394_v41 }
 0x10a   : > { %359 = vadd.xlane.f32.xlu0 %v358_v44 }
 0x10b   : > { %371 = vadd.xlane.f32.xlu1 %v370_v45 }
 0x10e   : > { %398 = vadd.xlane.f32.xlu0 %v397_v46 }
 0x10f   : > { %401 = vadd.xlane.f32.xlu1 %v400_v47 }
 0x17f   : > { %v387_v48 = vpop.xlane.xlu0 %386 }
 0x180   : > { %v363_v49 = vpop.xlane.xlu1 %362 }
 0x181   : > { %v405_v50 = vsub.f32 %v387_v48, %v363_v49 }
 0x183   : > { %v413_v51 = vsel %vm344_vm1, %v363_v49, %v405_v50  ;;  %v375_v52 = vpop.xlane.xlu0 %374 }
 0x184   : > { %v421_v53 = vmul.f32 0.0625, %v413_v51  ;;  %v390_v54 = vpop.xlane.xlu1 %389 }
 0x186   : > { %v1071_v55 = vsub.f32 %v773_v16, %v421_v53 }
 0x187   : > { %v381_v56 = vpop.xlane.xlu0 %380 }
 0x188   : > { %v366_v57 = vpop.xlane.xlu1 %365  ;;  %v437_v58 = vmul.f32 %v1071_v55, %v1071_v55 }
 0x189   : > { %v406_v59 = vsub.f32 %v390_v54, %v366_v57 }
 0x18a   : > { %v481_v60 = vsel %vm264_vm0, %v437_v58, 0.0  ;;  %v445_v63 = vsel %vm344_vm1, %v437_v58, 0.0 }
 0x18b   : > { %v414_v61 = vsel %vm344_vm1, %v366_v57, %v406_v59  ;;  %v393_v62 = vpop.xlane.xlu0 %392  ;;  %482 = vadd.xlane.f32.xlu0 %v481_v60  ;;  %v457_v3 = vsel %vm264_vm0, %v445_v63, 0.0 }
 0x18c   : > { %v422_v0 = vmul.f32 0.0625, %v414_v61  ;;  %v378_v1 = vpop.xlane.xlu1 %377 }
 0x18e   : > { %v1080_v2 = vsub.f32 %v774_v23, %v422_v0 }
 0x18f   : > { %v357_v4 = vpop.xlane.xlu0 %356  ;;  %458 = vadd.xlane.f32.xlu0 %v457_v3 }
 0x190   : > { %v384_v5 = vpop.xlane.xlu1 %383  ;;  %v438_v6 = vmul.f32 %v1080_v2, %v1080_v2  ;;  %v403_v12 = vsub.f32 %v381_v56, %v357_v4 }
 0x192   : > { %v484_v7 = vsel %vm264_vm0, %v438_v6, 0.0  ;;  %v446_v9 = vsel %vm344_vm1, %v438_v6, 0.0  ;;  %v411_v20 = vsel %vm344_vm1, %v357_v4, %v403_v12 }
 0x193   : > { %v369_v8 = vpop.xlane.xlu0 %368  ;;  %485 = vadd.xlane.f32.xlu1 %v484_v7  ;;  %v460_v11 = vsel %vm264_vm0, %v446_v9, 0.0  ;;  %v419_v31 = vmul.f32 0.0625, %v411_v20 }
 0x194   : > { %v396_v10 = vpop.xlane.xlu1 %395  ;;  %v407_v21 = vsub.f32 %v393_v62, %v369_v8 }
 0x195   : > { %v1105_v40 = vsub.f32 %v1015_v18, %v419_v31 }
 0x196   : > { %v415_v33 = vsel %vm344_vm1, %v369_v8, %v407_v21 }
 0x197   : > { %461 = vadd.xlane.f32.xlu1 %v460_v11  ;;  %v360_v13 = vpop.xlane.xlu0 %359  ;;  %v423_v41 = vmul.f32 0.0625, %v415_v33 }
 0x198   : > { %v404_v14 = vsub.f32 %v384_v5, %v360_v13  ;;  %v372_v16 = vpop.xlane.xlu1 %371 }
 0x199   : > { %v408_v25 = vsub.f32 %v396_v10, %v372_v16  ;;  %v1120_v18 = vsub.f32 %v1017_v19, %v423_v41 }
 0x19a   : > { %v412_v23 = vsel %vm344_vm1, %v360_v13, %v404_v14 }
 0x19b   : > { %v399_v22 = vpop.xlane.xlu0 %398  ;;  %v420_v34 = vmul.f32 0.0625, %v412_v23  ;;  %v416_v37 = vsel %vm344_vm1, %v372_v16, %v408_v25  ;;  %v439_v51 = vmul.f32 %v1120_v18, %v1120_v18  ;;  %v1162_v16 = vld [vmem:[%s1262_s2] ss:$0 sm:$0xff] }
 0x19c   : > { %v409_v28 = vsub.f32 %v399_v22, %v375_v52  ;;  %v402_v29 = vpop.xlane.xlu1 %401  ;;  %v424_v44 = vmul.f32 0.0625, %v416_v37  ;;  %v1169_v22 = vld [vmem:[%s1263_s3] ss:$0 sm:$0xff] }
 0x19d   : > { %v410_v30 = vsub.f32 %v402_v29, %v378_v1  ;;  %v1111_v43 = vsub.f32 %v1028_v26, %v420_v34  ;;  %v435_v26 = vmul.f32 %v1105_v40, %v1105_v40  ;;  %v447_v60 = vsel %vm344_vm1, %v439_v51, 0.0 }
 0x19e   : > { %v417_v32 = vsel %vm344_vm1, %v375_v52, %v409_v28  ;;  %v1128_v48 = vsub.f32 %v1030_v27, %v424_v44  ;;  %v487_v27 = vsel %vm264_vm0, %v439_v51, 0.0  ;;  %v463_v62 = vsel %vm264_vm0, %v447_v60, 0.0 }
 0x19f   : > { %v425_v35 = vmul.f32 0.0625, %v417_v32  ;;  %v418_v36 = vsel %vm344_vm1, %v378_v1, %v410_v30  ;;  %v436_v50 = vmul.f32 %v1111_v43, %v1111_v43  ;;  %v475_v19 = vsel %vm264_vm0, %v435_v26, 0.0 }
 0x1a0   : > { %v426_v38 = vmul.f32 0.0625, %v418_v36  ;;  %v440_v53 = vmul.f32 %v1128_v48, %v1128_v48  ;;  %v443_v56 = vsel %vm344_vm1, %v435_v26, 0.0 }
 0x1a1   : > { %v1102_v39 = vsub.f32 %v1013_v17, %v425_v35  ;;  %v478_v52 = vsel %vm264_vm0, %v436_v50, 0.0  ;;  %v444_v57 = vsel %vm344_vm1, %v436_v50, 0.0  ;;  %v451_v58 = vsel %vm264_vm0, %v443_v56, 0.0 }
 0x1a2   : > { %v1108_v42 = vsub.f32 %v1025_v24, %v426_v38  ;;  %v490_v54 = vsel %vm264_vm0, %v440_v53, 0.0  ;;  %v454_v59 = vsel %vm264_vm0, %v444_v57, 0.0  ;;  %v448_v61 = vsel %vm344_vm1, %v440_v53, 0.0 }
 0x1a3   : > { %v441_v45 = vmul.f32 %v1102_v39, %v1102_v39  ;;  %v466_v63 = vsel %vm264_vm0, %v448_v61, 0.0 }
 0x1a4   : > { %v442_v46 = vmul.f32 %v1108_v42, %v1108_v42 }
 0x1a5   : > { %v449_v17 = vsel %vm344_vm1, %v441_v45, 0.0  ;;  %v493_v0 = vsel %vm264_vm0, %v441_v45, 0.0 }
 0x1a6   : > { %v469_v47 = vsel %vm264_vm0, %v449_v17, 0.0  ;;  %v450_v24 = vsel %vm344_vm1, %v442_v46, 0.0  ;;  %v496_v1 = vsel %vm264_vm0, %v442_v46, 0.0 }
 0x1a7   : > { %470 = vadd.xlane.f32.xlu0 %v469_v47  ;;  %v472_v49 = vsel %vm264_vm0, %v450_v24, 0.0 }
 0x1a8   : > { %473 = vadd.xlane.f32.xlu1 %v472_v49 }
 0x1ab   : > { %476 = vadd.xlane.f32.xlu0 %v475_v19 }
 0x1ac   : > { %479 = vadd.xlane.f32.xlu1 %v478_v52 }
 0x1af   : > { %488 = vadd.xlane.f32.xlu0 %v487_v27 }
 0x1b0   : > { %491 = vadd.xlane.f32.xlu1 %v490_v54 }
 0x1b3   : > { %452 = vadd.xlane.f32.xlu0 %v451_v58 }
 0x1b4   : > { %455 = vadd.xlane.f32.xlu1 %v454_v59 }
 0x1b7   : > { %464 = vadd.xlane.f32.xlu0 %v463_v62 }
 0x1b8   : > { %467 = vadd.xlane.f32.xlu1 %v466_v63 }
 0x1bb   : > { %494 = vadd.xlane.f32.xlu0 %v493_v0 }
 0x1bc   : > { %497 = vadd.xlane.f32.xlu1 %v496_v1 }
 0x218   : > { %v483_v3 = vpop.xlane.xlu0 %482 }
 0x21c   : > { %v459_v4 = vpop.xlane.xlu0 %458 }
 0x21d   : > { %v501_v5 = vsub.f32 %v483_v3, %v459_v4 }
 0x21f   : > { %v509_v6 = vsel %vm344_vm1, %v459_v4, %v501_v5 }
 0x220   : > { %v517_v7 = vmul.f32 0.0625, %v509_v6  ;;  %v486_v8 = vpop.xlane.xlu1 %485 }
 0x222   : > { %v525_v9 = vadd.f32 1e-05, %v517_v7 }
 0x224   : > { %841 = vrsqrt.f32 %v525_v9  ;;  %v462_v10 = vpop.xlane.xlu1 %461 }
 0x225   : > { %v502_v11 = vsub.f32 %v486_v8, %v462_v10 }
 0x227   : > { %v510_v12 = vsel %vm344_vm1, %v462_v10, %v502_v11 }
 0x228   : > { %v518_v13 = vmul.f32 0.0625, %v510_v12 }
 0x22a   : > { %v526_v14 = vadd.f32 1e-05, %v518_v13 }
 0x22c   : > { %843 = vrsqrt.f32 %v526_v14 }
 0x22e   : > { %v842_v20 = vpop.eup %841 }
 0x22f   : > { %v548_v21 = vmul.f32 %v842_v20, %v1162_v16 }
 0x231   : > { %v556_v23 = vmul.f32 %v548_v21, %v1071_v55 }
 0x233   : > { %v571_v25 = vadd.f32 %v1169_v22, %v556_v23 }
 0x234   : > { %v471_v28 = vpop.xlane.xlu0 %470 }
 0x235   : > { %579 = vst.msk [vmem:[%s1173_s5 + $0x10] sm:$0xff] %vm264_vm0, %v571_v25  ;;  %v474_v29 = vpop.xlane.xlu1 %473 }
 0x236   : > { %v844_v30 = vpop.eup %843 }
 0x237   : > { %v549_v31 = vmul.f32 %v844_v30, %v1162_v16 }
 0x238   : > { %v477_v32 = vpop.xlane.xlu0 %476 }
 0x239   : > { %v557_v33 = vmul.f32 %v549_v31, %v1080_v2  ;;  %v480_v34 = vpop.xlane.xlu1 %479 }
 0x23b   : > { %v572_v35 = vadd.f32 %v1169_v22, %v557_v33 }
 0x23c   : > { %v489_v55 = vpop.xlane.xlu0 %488 }
 0x23d   : > { %580 = vst.msk [vmem:[%s1173_s5 + $0x18] sm:$0xff] %vm264_vm0, %v572_v35  ;;  %v492_v36 = vpop.xlane.xlu1 %491 }
 0x240   : > { %v453_v37 = vpop.xlane.xlu0 %452 }
 0x241   : > { %v499_v38 = vsub.f32 %v477_v32, %v453_v37  ;;  %v456_v41 = vpop.xlane.xlu1 %455 }
 0x242   : > { %v500_v44 = vsub.f32 %v480_v34, %v456_v41 }
 0x243   : > { %v507_v45 = vsel %vm344_vm1, %v453_v37, %v499_v38 }
 0x244   : > { %v515_v46 = vmul.f32 0.0625, %v507_v45  ;;  %v508_v17 = vsel %vm344_vm1, %v456_v41, %v500_v44  ;;  %v465_v47 = vpop.xlane.xlu0 %464 }
 0x245   : > { %v516_v2 = vmul.f32 0.0625, %v508_v17  ;;  %v503_v24 = vsub.f32 %v489_v55, %v465_v47  ;;  %v468_v26 = vpop.xlane.xlu1 %467 }
 0x246   : > { %v523_v49 = vadd.f32 1e-05, %v515_v46  ;;  %v504_v50 = vsub.f32 %v492_v36, %v468_v26 }
 0x247   : > { %v524_v19 = vadd.f32 1e-05, %v516_v2  ;;  %v511_v51 = vsel %vm344_vm1, %v465_v47, %v503_v24 }
 0x248   : > { %845 = vrsqrt.f32 %v523_v49  ;;  %v519_v52 = vmul.f32 0.0625, %v511_v51  ;;  %v512_v53 = vsel %vm344_vm1, %v468_v26, %v504_v50  ;;  %v495_v27 = vpop.xlane.xlu0 %494 }
 0x249   : > { %847 = vrsqrt.f32 %v524_v19  ;;  %v520_v54 = vmul.f32 0.0625, %v512_v53  ;;  %v505_v56 = vsub.f32 %v495_v27, %v471_v28  ;;  %v498_v57 = vpop.xlane.xlu1 %497 }
 0x24a   : > { %v527_v58 = vadd.f32 1e-05, %v519_v52  ;;  %v506_v59 = vsub.f32 %v498_v57, %v474_v29 }
 0x24b   : > { %v528_v60 = vadd.f32 1e-05, %v520_v54  ;;  %v513_v61 = vsel %vm344_vm1, %v471_v28, %v505_v56 }
 0x24c   : > { %849 = vrsqrt.f32 %v527_v58  ;;  %v521_v62 = vmul.f32 0.0625, %v513_v61  ;;  %v514_v63 = vsel %vm344_vm1, %v474_v29, %v506_v59 }
 0x24d   : > { %851 = vrsqrt.f32 %v528_v60  ;;  %v522_v0 = vmul.f32 0.0625, %v514_v63 }
 0x24e   : > { %v529_v1 = vadd.f32 1e-05, %v521_v62 }
 0x24f   : > { %v530_v3 = vadd.f32 1e-05, %v522_v0 }
 0x250   : > { %853 = vrsqrt.f32 %v529_v1 }
 0x251   : > { %855 = vrsqrt.f32 %v530_v3 }
 0x252   : > { %v846_v4 = vpop.eup %845 }
 0x253   : > { %v848_v5 = vpop.eup %847  ;;  %v546_v6 = vmul.f32 %v846_v4, %v1162_v16 }
 0x254   : > { %v547_v7 = vmul.f32 %v848_v5, %v1162_v16 }
 0x255   : > { %v554_v8 = vmul.f32 %v546_v6, %v1105_v40 }
 0x256   : > { %v850_v9 = vpop.eup %849  ;;  %v555_v15 = vmul.f32 %v547_v7, %v1111_v43 }
 0x257   : > { %v852_v10 = vpop.eup %851  ;;  %v569_v11 = vadd.f32 %v1169_v22, %v554_v8  ;;  %v550_v12 = vmul.f32 %v850_v9, %v1162_v16 }
 0x258   : > { %v570_v13 = vadd.f32 %v1169_v22, %v555_v15  ;;  %v551_v14 = vmul.f32 %v852_v10, %v1162_v16 }
 0x259   : > { %577 = vst.msk [vmem:[%s1173_s5] sm:$0xff] %vm264_vm0, %v569_v11  ;;  %v558_v20 = vmul.f32 %v550_v12, %v1120_v18 }
 0x25a   : > { %v854_v40 = vpop.eup %853  ;;  %578 = vst.msk [vmem:[%s1173_s5 + $0x8] sm:$0xff] %vm264_vm0, %v570_v13  ;;  %v559_v43 = vmul.f32 %v551_v14, %v1128_v48 }
 0x25b   : > { %v856_v21 = vpop.eup %855  ;;  %v573_v23 = vadd.f32 %v1169_v22, %v558_v20  ;;  %v552_v25 = vmul.f32 %v854_v40, %v1162_v16 }
 0x25c   : > { %v574_v28 = vadd.f32 %v1169_v22, %v559_v43  ;;  %v553_v29 = vmul.f32 %v856_v21, %v1162_v16  ;;  %591 = sbr.rel (!%p984_p5) target bundleno = 619 (0x26b), region = 40  ;;  %v644_v16 = vld [vmem:[%s1173_s5 + $0x10] sm:$0xff] (%p984_p5) }
 0x25d   : > { %581 = vst.msk [vmem:[%s1173_s5 + $0x20] sm:$0xff] %vm264_vm0, %v573_v23  ;;  %v560_v30 = vmul.f32 %v552_v25, %v1102_v39  ;;  %645 = vst [vmem:[%s598_s9 + $0x20] sm:$0xff] (%p984_p5), %v644_v16 }
 0x25e   : > { %582 = vst.msk [vmem:[%s1173_s5 + $0x28] sm:$0xff] %vm264_vm0, %v574_v28  ;;  %v561_v18 = vmul.f32 %v553_v29, %v1108_v42 }
 0x25f   : > { %v575_v31 = vadd.f32 %v1169_v22, %v560_v30 }
 0x260   : > { %v576_v48 = vadd.f32 %v1169_v22, %v561_v18  ;;  %v640_v39 = vld [vmem:[%s1173_s5] sm:$0xff] (%p984_p5)  ;;  %v646_v22 = vld [vmem:[%s1173_s5 + $0x18] sm:$0xff] (%p984_p5) }
 0x261   : > { %583 = vst.msk [vmem:[%s1173_s5 + $0x30] sm:$0xff] %vm264_vm0, %v575_v31  ;;  %v642_v42 = vld [vmem:[%s1173_s5 + $0x8] sm:$0xff] (%p984_p5)  ;;  %641 = vst [vmem:[%s598_s9] sm:$0xff] (%p984_p5), %v640_v39 }
 0x262   : > { %584 = vst.msk [vmem:[%s1173_s5 + $0x38] sm:$0xff] %vm264_vm0, %v576_v48  ;;  %643 = vst [vmem:[%s598_s9 + $0x10] sm:$0xff] (%p984_p5), %v642_v42 }
 0x263   : > { %647 = vst [vmem:[%s598_s9 + $0x30] sm:$0xff] %v646_v22 }
 0x264   : > { %v648_v32 = vld [vmem:[%s1173_s5 + $0x20] sm:$0xff] }
 0x265   : > { %v650_v33 = vld [vmem:[%s1173_s5 + $0x28] sm:$0xff]  ;;  %649 = vst [vmem:[%s598_s9 + $0x40] sm:$0xff] %v648_v32 }
 0x266   : > { %651 = vst [vmem:[%s598_s9 + $0x50] sm:$0xff] %v650_v33 }
 0x268   : > { %v652_v34 = vld [vmem:[%s1173_s5 + $0x30] sm:$0xff] }
 0x269   : > { %v654_v35 = vld [vmem:[%s1173_s5 + $0x38] sm:$0xff]  ;;  %653 = vst [vmem:[%s598_s9 + $0x60] sm:$0xff] %v652_v34 }
 0x26a   : > { %655 = vst [vmem:[%s598_s9 + $0x70] sm:$0xff] %v654_v35 }
 0x26b PF: > { %s14_s21 = sadd.s32 1, %s911_s21   ;;  %s1266_s15 = smov %s891_s16 }
 0x26c   : > { %p11_p10 = scmp.ge.s32.totalorder %s14_s21, 6   ;;  %s1267_s16 = smov %s995_s30 }
 0x26d   : > { %s1268_s17 = smov %s903_s19  ;;  %s1269_s18 = smov %s907_s20 }
 0x26e   : > { %s1270_s19 = smov %s1273_s22  ;;  %s1271_s20 = smov %s1277_s23 }
 0x26f   :  { %13 = sbr.rel (!%p11_p10) target bundleno = 4 (0x4), region = 105 }

</bundles_post_ra>
